<compile_context>
chip_gen: v5e
topology: v5e:2x2
jax: 0.10.0
libtpu: 0.0.40
codegen_flags: <defaults>
</compile_context>

<pallas_src>
import jax
import jax.numpy as jnp
from jax.experimental import pallas as pl
from jax.experimental.pallas import tpu as pltpu


# ----------------------------------------------------------------------------
# Init-time table (matches the PyTorch _get_pe_table)
# ----------------------------------------------------------------------------
def _make_pe_table(model_dim: int, max_seq_len: int = 200) -> jnp.ndarray:
    position = jnp.arange(max_seq_len, dtype=jnp.float32)[:, None]            # (L, 1)
    div_term = jnp.exp(
        -jnp.log(jnp.float32(10000.0))
        * jnp.arange(0, model_dim, 2, dtype=jnp.float32) / model_dim
    )[None, :]                                                                 # (1, D/2)
    angles = position * div_term                                               # (L, D/2)
    pe = jnp.zeros((max_seq_len, model_dim), dtype=jnp.float32)
    pe = pe.at[:, 0::2].set(jnp.sin(angles))
    pe = pe.at[:, 1::2].set(jnp.cos(angles))
    return pe


# ----------------------------------------------------------------------------
# Small layout helpers
# ----------------------------------------------------------------------------
def _sublane_pack(dtype) -> int:
    """Rows per packed sublane group: 8 (f32), 16 (bf16/f16), 32 (int8/fp8)."""
    return 8 * max(1, 4 // jnp.dtype(dtype).itemsize)


def _round_up(x: int, m: int) -> int:
    return ((x + m - 1) // m) * m


# ----------------------------------------------------------------------------
# Kernels (pure vld / vadd / vst)
# ----------------------------------------------------------------------------
def _add_pe_rows_kernel(x_ref, pe_ref, o_ref):
    # x_ref / o_ref: (TS, D) tile (batch dim squeezed); pe_ref: (TS, D) tile.
    o_ref[...] = x_ref[...] + pe_ref[...]


def _add_pe_flat_kernel(x_ref, pe_ref, o_ref):
    # x_ref / o_ref: (batch, TF) tile; pe_ref: (1, TF) tile broadcast over rows.
    o_ref[...] = x_ref[...] + pe_ref[...]


# ----------------------------------------------------------------------------
# Tile sizing (padding-aware, default-scoped-VMEM safe on v5e/v6e/v7x)
# ----------------------------------------------------------------------------
_VMEM_BUDGET_BYTES = 10 * 1024 * 1024  # per-step working set incl. double-buffering


def _pick_seq_tile(seq_len: int, model_dim: int, batch: int,
                   itemsize: int, pack: int) -> int:
    """Seq-tile rows for the sublane-dense path."""
    # Per seq row held per grid step: x + out + pe blocks, each double-buffered.
    bytes_per_row = 3 * model_dim * itemsize * 2
    ts = max(pack, _VMEM_BUDGET_BYTES // bytes_per_row)
    # Aim for >= 8 total grid steps (pipeline overlap + v7x megacore sharding).
    min_seq_tiles = max(1, -(-8 // batch))
    ts = min(ts, max(pack, -(-seq_len // min_seq_tiles)))
    ts = max(pack, (ts // pack) * pack)
    if ts >= seq_len:
        return int(seq_len)  # full dim -> always layout-legal
    return int(ts)


def _pick_flat_tile(flat: int, batch: int, itemsize: int, pack: int) -> int:
    """Lane-tile size (elements) for the flattened fallback path."""
    if flat <= 128:
        return flat
    # Padded sublane rows actually materialized in VMEM per block:
    x_rows = _round_up(batch, pack)   # x and out blocks pad batch up to the group
    pe_rows = pack                    # the (1, TF) pe block pads to a full group
    per_lane_bytes = (2 * x_rows + pe_rows) * itemsize * 2   # x2 double-buffering
    tf = _VMEM_BUDGET_BYTES // per_lane_bytes
    # Prefer >= 8 grid steps, but never shrink below 512 lanes (~85% of roofline).
    tf = min(tf, max(512, -(-flat // 8)))
    tf = max(128, (tf // 128) * 128)
    tf = min(tf, _round_up(flat, 128))
    if tf >= flat:
        tf = flat  # full dim -> layout-legal even if not a multiple of 128
    return int(tf)


# ----------------------------------------------------------------------------
# Path A: sublane-dense rows (model_dim % 128 == 0)
# ----------------------------------------------------------------------------
def _forward_rows(x, pe_slice, ts: int, donate: bool):
    batch, seq_len, model_dim = x.shape
    grid = (pl.cdiv(seq_len, ts), batch)  # seq outer, batch inner -> pe reused

    return pl.pallas_call(
        _add_pe_rows_kernel,
        out_shape=jax.ShapeDtypeStruct(x.shape, x.dtype),
        grid_spec=pltpu.PrefetchScalarGridSpec(
            num_scalar_prefetch=0,
            grid=grid,
            in_specs=[
                # batch dim squeezed out of the kernel view -> dense (TS, D) tiles
                pl.BlockSpec((None, ts, model_dim), lambda s, b: (b, s, 0)),
                # pe index ignores the inner batch axis -> fetched once per seq tile
                pl.BlockSpec((ts, model_dim), lambda s, b: (s, 0)),
            ],
            out_specs=pl.BlockSpec((None, ts, model_dim), lambda s, b: (b, s, 0)),
        ),
        compiler_params=pltpu.CompilerParams(
            dimension_semantics=("parallel", "parallel"),
        ),
        input_output_aliases=({0: 0} if donate else {}),
    )(x, pe_slice)


# ----------------------------------------------------------------------------
# Path B: lane-dense flattened fallback (model_dim not a multiple of 128)
# ----------------------------------------------------------------------------
def _forward_flat(x, pe_slice, tf: int, donate: bool):
    batch, seq_len, model_dim = x.shape
    flat = seq_len * model_dim
    x2 = x.reshape(batch, flat)          # free collapse of trailing dims
    pe2 = pe_slice.reshape(1, flat)

    out2 = pl.pallas_call(
        _add_pe_flat_kernel,
        out_shape=jax.ShapeDtypeStruct((batch, flat), x.dtype),
        grid_spec=pltpu.PrefetchScalarGridSpec(
            num_scalar_prefetch=0,
            grid=(pl.cdiv(flat, tf),),
            in_specs=[
                pl.BlockSpec((batch, tf), lambda s: (0, s)),  # x tile
                pl.BlockSpec((1, tf), lambda s: (0, s)),      # pe tile (read once)
            ],
            out_specs=pl.BlockSpec((batch, tf), lambda s: (0, s)),
        ),
        compiler_params=pltpu.CompilerParams(
            dimension_semantics=("parallel",),  # shardable across TCs (v7x megacore)
        ),
        input_output_aliases=({0: 0} if donate else {}),
    )(x2, pe2)

    return out2.reshape(batch, seq_len, model_dim)


# ----------------------------------------------------------------------------
# Public forward
# ----------------------------------------------------------------------------
def positional_encoding_forward(
    x: jnp.ndarray,
    pe_table: jnp.ndarray,
    *,
    seq_tile: int | None = None,
    flat_tile: int | None = None,
    donate_input: bool = False,
) -> jnp.ndarray:
    """x: (batch, seq_len, model_dim); returns x + pe_table[:seq_len]."""
    batch, seq_len, model_dim = x.shape
    max_seq_len = pe_table.shape[0]
    if seq_len > max_seq_len:
        raise ValueError(
            f"seq_len={seq_len} exceeds max_seq_len={max_seq_len} of pe_table"
        )

    # Init-time slice + dtype match (removes in-kernel converts, halves pe DMA
    # traffic for bf16 activations; <=1-ulp deviation vs f32-table add).
    pe_slice = pe_table[:seq_len].astype(x.dtype)

    itemsize = jnp.dtype(x.dtype).itemsize
    pack = _sublane_pack(x.dtype)

    if model_dim % 128 == 0:
        ts = seq_tile if seq_tile is not None else _pick_seq_tile(
            seq_len, model_dim, batch, itemsize, pack)
        return _forward_rows(x, pe_slice, ts, donate_input)

    flat = seq_len * model_dim
    tf = flat_tile if flat_tile is not None else _pick_flat_tile(
        flat, batch, itemsize, pack)
    return _forward_flat(x, pe_slice, tf, donate_input)


# ----------------------------------------------------------------------------
# Self-test
# ----------------------------------------------------------------------------
if __name__ == "__main__":
    key = jax.random.PRNGKey(0)
    k1, k2 = jax.random.split(key)

    # Case 1: model_dim=32 (not a multiple of 128) -> lane-dense flattened path.
    batch, seq_len, model_dim, max_seq_len = 2, 8, 32, 200
    x = jax.random.normal(k1, (batch, seq_len, model_dim), dtype=jnp.float32)
    pe_table = _make_pe_table(model_dim, max_seq_len)

    out = jax.block_until_ready(positional_encoding_forward(x, pe_table))
    ref = x + pe_table[:seq_len][None, :, :]
    assert out.shape == (batch, seq_len, model_dim)
    assert jnp.allclose(out, ref, atol=1e-6), "mismatch vs reference (flat)"

    # Forced small tile -> exercises the multi-step pipelined flat path.
    out_tiled = jax.block_until_ready(
        positional_encoding_forward(x, pe_table, flat_tile=128)
    )
    assert jnp.allclose(out_tiled, ref, atol=1e-6), "mismatch vs reference (flat tiled)"

    # Case 2: model_dim=128 -> sublane-dense rows path ((2, 2) grid, pe reused
    # across the inner batch axis).
    b2, s2, d2 = 2, 16, 128
    x_d = jax.random.normal(k2, (b2, s2, d2), dtype=jnp.float32)
    pe_d = _make_pe_table(d2, max_seq_len)

    out_d = jax.block_until_ready(positional_encoding_forward(x_d, pe_d))
    ref_d = x_d + pe_d[:s2][None, :, :]
    assert out_d.shape == (b2, s2, d2)
    assert jnp.allclose(out_d, ref_d, atol=1e-6), "mismatch vs reference (rows)"

    print("KERNEL_OK")
</pallas_src>

<mosaic_0001>
module attributes {stable_mosaic.version = 11 : i64} {
  func.func @_add_pe_flat_kernel(%arg0: i32, %arg1: memref<2x256xf32, #tpu.memory_space<vmem>>, %arg2: memref<1x256xf32, #tpu.memory_space<vmem>>, %arg3: memref<2x256xf32, #tpu.memory_space<vmem>>) attributes {dimension_semantics = [#tpu.dimension_semantics<parallel>], iteration_bounds = array<i64: 1>, scalar_prefetch = 0 : i64, scratch_operands = 0 : i64, tpu.core_type = #tpu.core_type<tc>, window_params = [{transform_indices = @transform_0, window_bounds = array<i64: 2, 256>}, {transform_indices = @transform_1, window_bounds = array<i64: 1, 256>}, {transform_indices = @transform_2, window_bounds = array<i64: 2, 256>}]} {
    %c0 = arith.constant 0 : index
    %c0_0 = arith.constant 0 : index
    %0 = vector.load %arg1[%c0, %c0_0] : memref<2x256xf32, #tpu.memory_space<vmem>>, vector<2x256xf32>
    %c0_1 = arith.constant 0 : index
    %c0_2 = arith.constant 0 : index
    %1 = vector.load %arg2[%c0_1, %c0_2] : memref<1x256xf32, #tpu.memory_space<vmem>>, vector<1x256xf32>
    %2 = vector.broadcast %1 : vector<1x256xf32> to vector<2x256xf32>
    %3 = arith.addf %0, %2 : vector<2x256xf32>
    %c0_3 = arith.constant 0 : index
    %c0_4 = arith.constant 0 : index
    %4 = vector.load %arg3[%c0_3, %c0_4] : memref<2x256xf32, #tpu.memory_space<vmem>>, vector<2x256xf32>
    tpu.vector_store %arg3[%c0_3, %c0_4], %3 {strides = array<i32>} : memref<2x256xf32, #tpu.memory_space<vmem>>, vector<2x256xf32>,
    return
  }
  func.func @transform_0(%arg0: i32) -> (i32, i32) {
    %c0_i32 = arith.constant 0 : i32
    %c0_i32_0 = arith.constant 0 : i32
    return %c0_i32, %arg0 : i32, i32
  }
  func.func @transform_1(%arg0: i32) -> (i32, i32) {
    %c0_i32 = arith.constant 0 : i32
    %c0_i32_0 = arith.constant 0 : i32
    return %c0_i32, %arg0 : i32, i32
  }
  func.func @transform_2(%arg0: i32) -> (i32, i32) {
    %c0_i32 = arith.constant 0 : i32
    %c0_i32_0 = arith.constant 0 : i32
    return %c0_i32, %arg0 : i32, i32
  }
}

</mosaic_0001>

<bundles_post_ra>
// kernel: tpu_custom_call.1
= control target key start
LH: loop header
LB: loop body
LE: loop exit
PB: predicated region body
PF: predicated region fallthrough
CT: control target
= control target key end

     0   :  { %7 = vsyncpa [#allocation3], 0  ;;  %s177_s0 = inlined_call_operand.hbm [shape: f32[2,256], index: 0, kind: input, shape index: {}]   ;;  %s178_s1 = inlined_call_operand.hbm [shape: f32[1,256], index: 1, kind: input, shape index: {}]   ;;  %s179_s2 = inlined_call_operand.hbm [shape: f32[2,256], index: 2, kind: output, shape index: {}]  }
   0x1   :  { %8 = vsyncpa [#allocation6], 0 }
   0x2   :  { %9 = vsyncpa [#allocation4], 0  ;;  %s15_s11 = sshll.u32 %s177_s0, 4  ;;  %s150_s12 = smov [#allocation2]   ;;  %s16_s11 = int_to_ptr.hbm [resolvable:$true] %s15_s11 }
   0x3   :  { %s17_s13 = sshll.u32 %s150_s12, 4  ;;  %s26_s16 = sshll.u32 %s178_s1, 4  ;;  %s18_s13 = int_to_ptr.vmem [resolvable:$true] %s17_s13  ;;  %s27_s16 = int_to_ptr.hbm [resolvable:$true] %s26_s16 }
   0x4   :  { %20 = dma.hbm_to_vmem [thread:$0]  %s16_s11, 64, %s18_s13, [#allocation3]  }
   0x5   :  { %s151_s17 = smov [#allocation5]  }
   0x6   :  { %s28_s18 = sshll.u32 %s151_s17, 4  ;;  %s29_s18 = int_to_ptr.vmem [resolvable:$true] %s28_s18 }
   0x7   :  { %31 = dma.hbm_to_vmem [thread:$0]  %s27_s16, 32, %s29_s18, [#allocation6]  }
   0x8   :  { %144 = dma.done.wait [#allocation3], 64  }
   0x9   :  { %145 = vsyncadd [#allocation3], 4294967232 }
   0xa   :  { %146 = dma.done.wait [#allocation6], 32  }
   0xb   :  { %147 = vsyncadd [#allocation6], 4294967264  ;;  %v41_v0 = vld [vmem:[#allocation5] sm:$0x3]  ;;  %vm46_vm0 = vcmask 1041408   ;;  %s152_s0 = smov [#allocation7]  }
   0xc   :  { %v43_v1 = vperm.slane %v41_v0, 0  ;;  %v44_v2 = vperm.slane %v41_v0, 1  ;;  %v40_v3 = vld [vmem:[#allocation2] sm:$0xf]  ;;  %s56_s19 = sshll.u32 %s152_s0, 4  ;;  %s58_s21 = sshll.u32 %s179_s2, 4  ;;  %s57_s19 = int_to_ptr.vmem [resolvable:$true] %s56_s19  ;;  %s59_s21 = int_to_ptr.hbm [resolvable:$true] %s58_s21 }
   0xe   :  { %v45_v4 = vrot.slane %v44_v2, 6 }
  0x10   :  { %v47_v5 = vsel %vm46_vm0, %v43_v1, %v45_v4 }
  0x11   :  { %v49_v6 = vadd.f32 %v47_v5, %v40_v3 }
  0x13   :  { %50 = vst [vmem:[#allocation7] sm:$0xf] %v49_v6 }
  0x14   :  { %61 = dma.vmem_to_hbm [thread:$0]  %s57_s19, 64, %s59_s21, [#allocation4]  }
  0x15   :  { %148 = dma.done.wait [#allocation4], 64  }
  0x16   :  { %149 = vsyncadd [#allocation4], 4294967232 }
  0x17   :  { %66 = vsyncpa [#allocation3], 1 }
  0x18   :  { %67 = vsyncpa [#allocation6], 1 }
  0x19   :  { %68 = vsyncpa [#allocation4], 1 }

</bundles_post_ra>
